<compile_context>
chip_gen: v7x
topology: tpu7x:2x2x1
jax: 0.10.0
libtpu: 0.0.40
codegen_flags: <defaults>
</compile_context>

<pallas_src>
import functools

import jax
import jax.numpy as jnp
from jax.experimental import pallas as pl
from jax.experimental.pallas import tpu as pltpu

_HEAD_PAD = 128  # lane-dense width of the fused (mean | value) output slab


def _round_up(n, m):
    return ((n + m - 1) // m) * m


def _ppo_forward_kernel(
    x_ref,            # [TB, obs_dim]
    w1_ref, b1_ref,   # [obs_dim, H], [1, H]
    w2_ref, b2_ref,   # [H, H],       [1, H]
    wh_ref, bh_ref,   # [H, 128],     [1, 128]   (fused mean|value head, 0-padded)
    out_ref,          # [TB, 128]  (out)  cols [:A]=mean, [A]=value, rest zero
):
    x = x_ref[...]

    # feature_extractor: Linear -> Tanh -> Linear -> Tanh
    h1 = jnp.tanh(
        jnp.dot(x, w1_ref[...], preferred_element_type=jnp.float32) + b1_ref[...]
    )
    h2 = jnp.tanh(
        jnp.dot(h1, w2_ref[...], preferred_element_type=jnp.float32) + b2_ref[...]
    )

    # fused policy-mean + value head, single lane-dense store
    head = jnp.dot(h2, wh_ref[...], preferred_element_type=jnp.float32) + bh_ref[...]
    out_ref[...] = head.astype(out_ref.dtype)


@functools.partial(jax.jit, static_argnames=("tile_b",))
def ppo_policy_forward(x, params, tile_b=256):
    """Run the PPOPolicy forward pass with a batch-gridded Pallas kernel.

    x: [B, obs_dim] float32
    params: dict with keys w1, b1, w2, b2, wm, bm, wv, bv, log_std
            (weights stored transposed to [in, out], biases [1, out]).
    Returns (action_mean [B, A], action_std [B, A], value [B, 1]).
    """
    B, obs_dim = x.shape
    H = params["w1"].shape[1]
    A = params["wm"].shape[1]
    assert A + 1 <= _HEAD_PAD, "action_dim + 1 must fit in the 128-lane head slab"

    # Fuse the two heads into one lane-dense [H, 128] weight (zero-padded).
    wh = jnp.zeros((H, _HEAD_PAD), jnp.float32)
    wh = wh.at[:, :A].set(params["wm"]).at[:, A:A + 1].set(params["wv"])
    bh = jnp.zeros((1, _HEAD_PAD), jnp.float32)
    bh = bh.at[:, :A].set(params["bm"]).at[:, A:A + 1].set(params["bv"])

    # Batch tiling: TB rows per grid step (multiple of 8 for sublane alignment).
    TB = min(tile_b, _round_up(B, 8))
    Bp = _round_up(B, TB)
    if Bp != B:
        x = jnp.pad(x, ((0, Bp - B), (0, 0)))

    const = lambda i: (0, 0)        # weights/biases: VMEM-resident across steps
    batch = lambda i: (i, 0)        # x / output: tiled along the batch axis

    out = pl.pallas_call(
        _ppo_forward_kernel,
        out_shape=jax.ShapeDtypeStruct((Bp, _HEAD_PAD), jnp.float32),
        grid=(Bp // TB,),
        in_specs=[
            pl.BlockSpec((TB, obs_dim), batch),
            pl.BlockSpec((obs_dim, H), const),
            pl.BlockSpec((1, H), const),
            pl.BlockSpec((H, H), const),
            pl.BlockSpec((1, H), const),
            pl.BlockSpec((H, _HEAD_PAD), const),
            pl.BlockSpec((1, _HEAD_PAD), const),
        ],
        out_specs=pl.BlockSpec((TB, _HEAD_PAD), batch),
        compiler_params=pltpu.CompilerParams(
            dimension_semantics=("parallel",),   # shard batch steps over v7x's 2 TCs
            vmem_limit_bytes=16 * 1024 * 1024,   # tiny tiles; safe on v5e/v6e/v7x
        ),
    )(x, params["w1"], params["b1"], params["w2"], params["b2"], wh, bh)

    action_mean = out[:B, :A]
    value = out[:B, A:A + 1]
    # std is batch-independent: compute & broadcast outside the kernel (no HBM writeback).
    action_std = jnp.broadcast_to(jnp.exp(params["log_std"]), (B, A))
    return action_mean, action_std, value


def init_ppo_params(key, obs_dim, action_dim, hidden_dim=64):
    """Deterministic init mimicking nn.Linear's uniform(-1/sqrt(fan_in), ...)."""
    def linear(k, fan_in, fan_out):
        kw, kb = jax.random.split(k)
        bound = 1.0 / jnp.sqrt(jnp.float32(fan_in))
        w = jax.random.uniform(kw, (fan_in, fan_out), jnp.float32, -bound, bound)
        b = jax.random.uniform(kb, (1, fan_out), jnp.float32, -bound, bound)
        return w, b

    k1, k2, k3, k4 = jax.random.split(key, 4)
    w1, b1 = linear(k1, obs_dim, hidden_dim)
    w2, b2 = linear(k2, hidden_dim, hidden_dim)
    wm, bm = linear(k3, hidden_dim, action_dim)
    wv, bv = linear(k4, hidden_dim, 1)
    log_std = jnp.zeros((1, action_dim), jnp.float32)  # nn.Parameter(torch.zeros(A))
    return dict(w1=w1, b1=b1, w2=w2, b2=b2, wm=wm, bm=bm, wv=wv, bv=bv,
                log_std=log_std)


def ppo_policy_forward_ref(x, p):
    """Pure-JAX reference for correctness checking."""
    h1 = jnp.tanh(x @ p["w1"] + p["b1"])
    h2 = jnp.tanh(h1 @ p["w2"] + p["b2"])
    mean = h2 @ p["wm"] + p["bm"]
    std = jnp.broadcast_to(jnp.exp(p["log_std"]), mean.shape)
    value = h2 @ p["wv"] + p["bv"]
    return mean, std, value


if __name__ == "__main__":
    key = jax.random.PRNGKey(0)
    kx, kp = jax.random.split(key)

    B, obs_dim, action_dim, hidden_dim = 8, 16, 4, 32

    x = jax.random.normal(kx, (B, obs_dim), dtype=jnp.float32)
    params = init_ppo_params(kp, obs_dim, action_dim, hidden_dim)

    mean, std, value = ppo_policy_forward(x, params)
    jax.block_until_ready((mean, std, value))

    # correctness check vs pure-JAX reference
    mean_r, std_r, value_r = ppo_policy_forward_ref(x, params)
    assert mean.shape == (B, action_dim)
    assert std.shape == (B, action_dim)
    assert value.shape == (B, 1)
    assert jnp.allclose(mean, mean_r, atol=1e-5, rtol=1e-5)
    assert jnp.allclose(std, std_r, atol=1e-6, rtol=1e-6)
    assert jnp.allclose(value, value_r, atol=1e-5, rtol=1e-5)

    # also exercise a ragged, multi-tile batch to cover the grid + padding path
    B2 = 1000
    x2 = jax.random.normal(kx, (B2, obs_dim), dtype=jnp.float32)
    m2, s2, v2 = ppo_policy_forward(x2, params)
    jax.block_until_ready((m2, s2, v2))
    m2r, s2r, v2r = ppo_policy_forward_ref(x2, params)
    assert jnp.allclose(m2, m2r, atol=1e-5, rtol=1e-5)
    assert jnp.allclose(v2, v2r, atol=1e-5, rtol=1e-5)

    print("KERNEL_OK")
</pallas_src>

<mosaic_0001>
module attributes {stable_mosaic.version = 11 : i64} {
  func.func @_ppo_forward_kernel(%arg0: i32, %arg1: memref<8x16xf32, #tpu.memory_space<vmem>>, %arg2: memref<16x32xf32, #tpu.memory_space<vmem>>, %arg3: memref<1x32xf32, #tpu.memory_space<vmem>>, %arg4: memref<32x32xf32, #tpu.memory_space<vmem>>, %arg5: memref<1x32xf32, #tpu.memory_space<vmem>>, %arg6: memref<32x128xf32, #tpu.memory_space<vmem>>, %arg7: memref<1x128xf32, #tpu.memory_space<vmem>>, %arg8: memref<8x128xf32, #tpu.memory_space<vmem>>) attributes {dimension_semantics = [#tpu.dimension_semantics<parallel>], iteration_bounds = array<i64: 1>, scalar_prefetch = 0 : i64, scratch_operands = 0 : i64, tpu.core_type = #tpu.core_type<tc>, window_params = [{transform_indices = @transform_0, window_bounds = array<i64: 8, 16>}, {pipeline_mode = #tpu.pipeline_mode<synchronous>, transform_indices = @transform_1, window_bounds = array<i64: 16, 32>}, {pipeline_mode = #tpu.pipeline_mode<synchronous>, transform_indices = @transform_2, window_bounds = array<i64: 1, 32>}, {pipeline_mode = #tpu.pipeline_mode<synchronous>, transform_indices = @transform_3, window_bounds = array<i64: 32, 32>}, {pipeline_mode = #tpu.pipeline_mode<synchronous>, transform_indices = @transform_4, window_bounds = array<i64: 1, 32>}, {pipeline_mode = #tpu.pipeline_mode<synchronous>, transform_indices = @transform_5, window_bounds = array<i64: 32, 128>}, {pipeline_mode = #tpu.pipeline_mode<synchronous>, transform_indices = @transform_6, window_bounds = array<i64: 1, 128>}, {transform_indices = @transform_7, window_bounds = array<i64: 8, 128>}]} {
    %c0 = arith.constant 0 : index
    %c0_0 = arith.constant 0 : index
    %0 = vector.load %arg1[%c0, %c0_0] : memref<8x16xf32, #tpu.memory_space<vmem>>, vector<8x16xf32>
    %c0_1 = arith.constant 0 : index
    %c0_2 = arith.constant 0 : index
    %1 = vector.load %arg2[%c0_1, %c0_2] : memref<16x32xf32, #tpu.memory_space<vmem>>, vector<16x32xf32>
    %cst = arith.constant dense<0.000000e+00> : vector<8x32xf32>
    %2 = tpu.matmul %0, %1, %cst {dimension_numbers = #tpu.dot_dimension_numbers<[1], [0], [0], [1], [0, 0, 1, 1], [], []>} : vector<8x16xf32>, vector<16x32xf32>, vector<8x32xf32> -> vector<8x32xf32>
    %c0_3 = arith.constant 0 : index
    %c0_4 = arith.constant 0 : index
    %3 = vector.load %arg3[%c0_3, %c0_4] : memref<1x32xf32, #tpu.memory_space<vmem>>, vector<1x32xf32>
    %4 = vector.broadcast %3 : vector<1x32xf32> to vector<8x32xf32>
    %5 = arith.addf %2, %4 : vector<8x32xf32>
    %6 = math.tanh %5 : vector<8x32xf32>
    %c0_5 = arith.constant 0 : index
    %c0_6 = arith.constant 0 : index
    %7 = vector.load %arg4[%c0_5, %c0_6] : memref<32x32xf32, #tpu.memory_space<vmem>>, vector<32x32xf32>
    %cst_7 = arith.constant dense<0.000000e+00> : vector<8x32xf32>
    %8 = tpu.matmul %6, %7, %cst_7 {dimension_numbers = #tpu.dot_dimension_numbers<[1], [0], [0], [1], [0, 0, 1, 1], [], []>} : vector<8x32xf32>, vector<32x32xf32>, vector<8x32xf32> -> vector<8x32xf32>
    %c0_8 = arith.constant 0 : index
    %c0_9 = arith.constant 0 : index
    %9 = vector.load %arg5[%c0_8, %c0_9] : memref<1x32xf32, #tpu.memory_space<vmem>>, vector<1x32xf32>
    %10 = vector.broadcast %9 : vector<1x32xf32> to vector<8x32xf32>
    %11 = arith.addf %8, %10 : vector<8x32xf32>
    %12 = math.tanh %11 : vector<8x32xf32>
    %c0_10 = arith.constant 0 : index
    %c0_11 = arith.constant 0 : index
    %13 = vector.load %arg6[%c0_10, %c0_11] : memref<32x128xf32, #tpu.memory_space<vmem>>, vector<32x128xf32>
    %cst_12 = arith.constant dense<0.000000e+00> : vector<8x128xf32>
    %14 = tpu.matmul %12, %13, %cst_12 {dimension_numbers = #tpu.dot_dimension_numbers<[1], [0], [0], [1], [0, 0, 1, 1], [], []>} : vector<8x32xf32>, vector<32x128xf32>, vector<8x128xf32> -> vector<8x128xf32>
    %c0_13 = arith.constant 0 : index
    %c0_14 = arith.constant 0 : index
    %15 = vector.load %arg7[%c0_13, %c0_14] : memref<1x128xf32, #tpu.memory_space<vmem>>, vector<1x128xf32>
    %16 = vector.broadcast %15 : vector<1x128xf32> to vector<8x128xf32>
    %17 = arith.addf %14, %16 : vector<8x128xf32>
    %c0_15 = arith.constant 0 : index
    %c0_16 = arith.constant 0 : index
    %18 = vector.load %arg8[%c0_15, %c0_16] : memref<8x128xf32, #tpu.memory_space<vmem>>, vector<8x128xf32>
    tpu.vector_store %arg8[%c0_15, %c0_16], %17 {strides = array<i32>} : memref<8x128xf32, #tpu.memory_space<vmem>>, vector<8x128xf32>,
    return
  }
  func.func @transform_0(%arg0: i32) -> (i32, i32) {
    %c0_i32 = arith.constant 0 : i32
    %c0_i32_0 = arith.constant 0 : i32
    return %arg0, %c0_i32 : i32, i32
  }
  func.func @transform_1(%arg0: i32) -> (i32, i32) {
    %c0_i32 = arith.constant 0 : i32
    %c0_i32_0 = arith.constant 0 : i32
    %c0_i32_1 = arith.constant 0 : i32
    return %c0_i32, %c0_i32_0 : i32, i32
  }
  func.func @transform_2(%arg0: i32) -> (i32, i32) {
    %c0_i32 = arith.constant 0 : i32
    %c0_i32_0 = arith.constant 0 : i32
    %c0_i32_1 = arith.constant 0 : i32
    return %c0_i32, %c0_i32_0 : i32, i32
  }
  func.func @transform_3(%arg0: i32) -> (i32, i32) {
    %c0_i32 = arith.constant 0 : i32
    %c0_i32_0 = arith.constant 0 : i32
    %c0_i32_1 = arith.constant 0 : i32
    return %c0_i32, %c0_i32_0 : i32, i32
  }
  func.func @transform_4(%arg0: i32) -> (i32, i32) {
    %c0_i32 = arith.constant 0 : i32
    %c0_i32_0 = arith.constant 0 : i32
    %c0_i32_1 = arith.constant 0 : i32
    return %c0_i32, %c0_i32_0 : i32, i32
  }
  func.func @transform_5(%arg0: i32) -> (i32, i32) {
    %c0_i32 = arith.constant 0 : i32
    %c0_i32_0 = arith.constant 0 : i32
    %c0_i32_1 = arith.constant 0 : i32
    return %c0_i32, %c0_i32_0 : i32, i32
  }
  func.func @transform_6(%arg0: i32) -> (i32, i32) {
    %c0_i32 = arith.constant 0 : i32
    %c0_i32_0 = arith.constant 0 : i32
    %c0_i32_1 = arith.constant 0 : i32
    return %c0_i32, %c0_i32_0 : i32, i32
  }
  func.func @transform_7(%arg0: i32) -> (i32, i32) {
    %c0_i32 = arith.constant 0 : i32
    %c0_i32_0 = arith.constant 0 : i32
    return %arg0, %c0_i32 : i32, i32
  }
}

</mosaic_0001>

<bundles_post_ra>
// kernel: ppo_policy_forward.1
= control target key start
LH: loop header
LB: loop body
LE: loop exit
PB: predicated region body
PF: predicated region fallthrough
CT: control target
= control target key end

     0   :  { %v356_v0 = vmov 0.0|0.0   ;;  %vm357_vm0 = vmmov 0   ;;  %v358_v3 = vmov 0.0   ;;  %vm36_vm1 = vcmask 130048   ;;  %s446_s1 = inlined_call_operand.vmem [shape: f32[16,32], index: 1, kind: input, shape index: {}]   ;;  %s447_s0 = inlined_call_operand.vmem [shape: f32[8,16], index: 0, kind: input, shape index: {}]   ;;  %s448_s3 = inlined_call_operand.vmem [shape: f32[32,32], index: 3, kind: input, shape index: {}]   ;;  %s449_s2 = inlined_call_operand.vmem [shape: f32[1,32], index: 2, kind: input, shape index: {}]   ;;  %s450_s5 = inlined_call_operand.vmem [shape: f32[32,128], index: 5, kind: input, shape index: {}]   ;;  %s451_s4 = inlined_call_operand.vmem [shape: f32[1,32], index: 4, kind: input, shape index: {}]   ;;  %s452_s6 = inlined_call_operand.vmem [shape: f32[1,128], index: 6, kind: input, shape index: {}]   ;;  %s453_s7 = inlined_call_operand.vmem [shape: f32[8,128], index: 7, kind: output, shape index: {}]  }
   0x1   :  { %334 = vmatprep.subr.bf16.mxu0 %v356_v0  ;;  %v27_v1 = vld [vmem:[%s446_s1] sm:$0xff]  ;;  %v28_v2 = vld [vmem:[%s446_s1 + $0x8] sm:$0xff]  ;;  %309 = vmatprep.mubr.msk.f32.mxu0 %vm357_vm0, %v358_v3  ;;  %v113_v8 = vld [vmem:[%s448_s3 + $0x10] sm:$0xff]  ;;  %vm122_vm2 = vcmask 261120  }
   0x2   :  { %v335_v4 = vpack.c.bf16 %v28_v2, %v27_v1  ;;  %337 = vmatprep.subr.bf16.mxu1 %v356_v0  ;;  %320 = vmatprep.mubr.msk.f32.mxu1 %vm357_vm0, %v358_v3  ;;  %v26_v5 = vld [vmem:[%s447_s0] sm:$0xff]  ;;  %v112_v7 = vld [vmem:[%s448_s3 + $0x8] sm:$0xff]  ;;  %v114_v10 = vld [vmem:[%s448_s3 + $0x18] sm:$0xff] }
   0x3   :  { %v111_v6 = vld [vmem:[%s448_s3] sm:$0xff]  ;;  %v341_v11 = vpack.c.bf16 %v114_v10, %v113_v8  ;;  %v198_v18 = vld [vmem:[%s450_s5 + $0x8] sm:$0xff]  ;;  %v199_v19 = vld [vmem:[%s450_s5 + $0x10] sm:$0xff] }
   0x4   :  { %336 = vmatpush3.bf16.msra.mxu0 %v335_v4  ;;  %v338_v9 = vpack.c.bf16 %v112_v7, %v111_v6  ;;  %v286_v12 = vld [vmem:[%s449_s2] ss:$0 sm:$0xff]  ;;  %v200_v21 = vld [vmem:[%s450_s5 + $0x18] sm:$0xff] }
   0x5   :  { %343 = vmatprep.subr.bf16.mxu0 %v356_v0  ;;  %v197_v17 = vld [vmem:[%s450_s5] sm:$0xff]  ;;  %v347_v22 = vpack.c.bf16 %v200_v21, %v199_v19 }
   0x6   :  { %339 = vmatpush3.bf16.msra.mxu1 %v338_v9  ;;  %v344_v20 = vpack.c.bf16 %v198_v18, %v197_v17  ;;  %v288_v23 = vld [vmem:[%s451_s4] ss:$0 sm:$0xff] }
   0x7   :  { %310 = vmatmul.mubr.msk.f32.vlgmr.msra.gmra.mrb[0].mxu0 %vm36_vm1, %v26_v5  ;;  %340 = vmatprep.subr.bf16.mxu1 %v356_v0  ;;  %v290_v28 = vld [vmem:[%s452_s6] ss:$0 sm:$0xff] }
   0x8   :  { %331 = vmatprep.mubr.msk.f32.mxu0 %vm357_vm0, %v358_v3  ;;  %345 = vmatpush3.bf16.msra.mxu0 %v344_v20 }
   0x9   :  { %346 = vmatprep.subr.bf16.mxu0 %v356_v0 }
   0xa   :  { %342 = vmatpush3.bf16.msra.mxu1 %v341_v11 }
   0xc   :  { %348 = vmatpush3.bf16.msra.mxu0 %v347_v22 }
  0xda   :  { %v106_v13 = vpop.f32.mrb[0].mxu0 }
  0xdb   :  { %v107_v14 = vadd.f32 %v286_v12, %v106_v13  ;;  %v311_v15 = vpop.f32.mrb[1].mxu0 }
  0xdd   :  { %352 = vtanh.f32 %v107_v14 }
  0xe7   :  { %v353_v16 = vpop.eup %352 }
  0xe8   :  { %321 = vmatmul.mubr.msk.f32.vlgmr.msra.gmra.mrb[0].mxu1 %vm122_vm2, %v353_v16 }
 0x1bb   :  { %v192_v24 = vpop.f32.mrb[0].mxu1 }
 0x1bc   :  { %v193_v25 = vadd.f32 %v288_v23, %v192_v24  ;;  %v322_v26 = vpop.f32.mrb[1].mxu1 }
 0x1be   :  { %354 = vtanh.f32 %v193_v25 }
 0x1c8   :  { %v355_v27 = vpop.eup %354 }
 0x1c9   :  { %332 = vmatmul.mubr.msk.f32.vlgmr.msra.gmra.mrb[2].mxu0 %vm122_vm2, %v355_v27 }
 0x29c   :  { %v277_v29 = vpop.f32.mrb[2].mxu0 }
 0x29d   :  { %v278_v30 = vadd.f32 %v290_v28, %v277_v29  ;;  %v333_v31 = vpop.f32.mrb[3].mxu0 }
 0x29f   :  { %281 = vst [vmem:[%s453_s7] sm:$0xff] %v278_v30 }

</bundles_post_ra>
